<compile_context>
chip_gen: v7x
topology: tpu7x:2x2x1
jax: 0.10.0
libtpu: 0.0.40
codegen_flags: <defaults>
</compile_context>

<pallas_src>
import jax
import jax.numpy as jnp
from jax.experimental import pallas as pl
from jax.experimental.pallas import tpu as pltpu

EPS = 1e-5
_VMEM_LIMIT = 32 * 1024 * 1024  # safe on v5e / v6e / v7x (v7x physical = 64 MiB)


def _stats_kernel(x_ref, s_ref, ss_ref):
    """Per-channel sum and sum-of-squares, accumulated across the batch grid."""
    @pl.when(pl.program_id(0) == 0)
    def _():
        s_ref[...] = jnp.zeros_like(s_ref)
        ss_ref[...] = jnp.zeros_like(ss_ref)

    x = x_ref[0]                                         # (C, HW) f32
    s_ref[...] += jnp.sum(x, axis=1, keepdims=True)
    ss_ref[...] += jnp.sum(x * x, axis=1, keepdims=True)


def _make_main_kernel(N, C, H, W, compute_dead_branch):
    HW = H * W
    inv_cnt = 1.0 / float(N * HW)
    offsets = [(dh, dw) for dh in (-1, 0, 1) for dw in (-1, 0, 1)]

    def kernel(*refs):
        if compute_dead_branch:
            (x_ref, s_ref, ss_ref,
             w1_ref, cb1_ref, g1_ref, be1_ref,
             w2_ref, cb2_ref, g2_ref, be2_ref,
             out_ref, br_ref) = refs
        else:
            (x_ref, s_ref, ss_ref,
             w2_ref, cb2_ref, g2_ref, be2_ref,
             out_ref) = refs

        x2 = x_ref[0]                                    # (C, HW) f32, this sample

        # Batch statistics from the stats pass; shared by bn1 and bn2.
        mean = s_ref[...] * inv_cnt                      # (C, 1)
        var = ss_ref[...] * inv_cnt - mean * mean        # biased (training mode)
        inv_std = jax.lax.rsqrt(var + EPS)               # (C, 1)

        # Boundary masks, hoisted once and shared by all taps / both convs.
        p_idx = jax.lax.broadcasted_iota(jnp.int32, (1, HW), 1)
        h_idx = p_idx // W
        w_idx = p_idx % W
        masks = []
        for dh, dw in offsets:
            if dh == 0 and dw == 0:
                masks.append(None)
            else:
                masks.append((h_idx + dh >= 0) & (h_idx + dh <= H - 1) &
                             (w_idx + dw >= 0) & (w_idx + dw <= W - 1))

        def bn_relu(g_ref, b_ref):
            scale = g_ref[...] * inv_std                 # (C, 1)
            bias = b_ref[...] - mean * scale             # (C, 1)
            return jnp.maximum(x2 * scale + bias, 0.0)   # (C, HW) f32

        def conv3x3_same(act, w_ref, cb_ref):
            # 3x3 conv, stride 1, padding 1, as 9 accumulated tap-matmuls.
            # Each tap is rolled / masked / cast to bf16 one at a time; only a
            # single tap is live (no materialized im2col slab).
            acc = jnp.zeros((C, HW), jnp.float32)
            for t, (dh, dw) in enumerate(offsets):
                s = dh * W + dw
                if s == 0:
                    tap = act.astype(jnp.bfloat16)
                else:
                    shifted = jnp.roll(act, -s, axis=1)  # tap[p] = act[p + s]
                    tap = jnp.where(masks[t], shifted, 0.0).astype(jnp.bfloat16)
                acc = acc + jnp.dot(w_ref[t], tap,
                                    preferred_element_type=jnp.float32)
            return acc + cb_ref[...]                     # conv bias broadcast

        # out = conv2(relu(bn2(x))) + shortcut(x)   (identity shortcut)
        out_ref[0] = conv3x3_same(bn_relu(g2_ref, be2_ref), w2_ref, cb2_ref) + x2

        if compute_dead_branch:
            # Dead branch of the literal forward: conv1(relu(bn1(x))).
            br_ref[0] = conv3x3_same(bn_relu(g1_ref, be1_ref), w1_ref, cb1_ref)

    return kernel


def preact_resblock(x_nchw, params, *, compute_dead_branch=False):
    """NCHW in / NCHW out; parameters in PyTorch layouts."""
    w1, b1, g1, beta1, w2, b2, g2, beta2 = params
    N, C, H, W = x_nchw.shape
    HW = H * W

    # Free reshape of contiguous NCHW: (N, C, H*W); lane dim = H*W.
    x3 = x_nchw.reshape(N, C, HW).astype(jnp.float32)

    def tap_w(w):
        # torch (Cout, Cin, 3, 3) -> (9, Cout, Cin), tap index t = kh*3 + kw.
        co, ci = w.shape[0], w.shape[1]
        return jnp.transpose(w, (2, 3, 0, 1)).reshape(9, co, ci).astype(jnp.bfloat16)

    col = lambda v: v.reshape(-1, 1).astype(jnp.float32)
    vec_spec = pl.BlockSpec((C, 1), lambda n: (0, 0))
    x_spec = pl.BlockSpec((1, C, HW), lambda n: (n, 0, 0))
    w_spec = pl.BlockSpec((9, C, C), lambda n: (0, 0, 0))

    # ---- Pass 1: per-channel batch statistics (sum, sum of squares). -------
    sum_c, sumsq_c = pl.pallas_call(
        _stats_kernel,
        out_shape=(jax.ShapeDtypeStruct((C, 1), jnp.float32),
                   jax.ShapeDtypeStruct((C, 1), jnp.float32)),
        grid_spec=pltpu.PrefetchScalarGridSpec(
            num_scalar_prefetch=0,
            grid=(N,),
            in_specs=[x_spec],
            out_specs=(vec_spec, vec_spec)),
        compiler_params=pltpu.CompilerParams(
            dimension_semantics=("arbitrary",),          # accumulator over batch
            vmem_limit_bytes=_VMEM_LIMIT),
        cost_estimate=pl.CostEstimate(
            flops=int(3 * N * C * HW), transcendentals=0,
            bytes_accessed=int(4 * N * C * HW + 8 * C)),
    )(x3)

    # ---- Pass 2: per-sample BN + ReLU + conv + residual. -------------------
    in_arrays = [x3, sum_c, sumsq_c]
    in_specs = [x_spec, vec_spec, vec_spec]

    def add_conv_params(w, b, g, be):
        in_arrays.extend([tap_w(w), col(b), col(g), col(be)])
        in_specs.extend([w_spec, vec_spec, vec_spec, vec_spec])

    if compute_dead_branch:
        add_conv_params(w1, b1, g1, beta1)
    add_conv_params(w2, b2, g2, beta2)

    out_shapes = [jax.ShapeDtypeStruct((N, C, HW), jnp.float32)]
    out_specs = [x_spec]
    if compute_dead_branch:
        out_shapes.append(jax.ShapeDtypeStruct((N, C, HW), jnp.float32))
        out_specs.append(x_spec)

    n_convs = 2 if compute_dead_branch else 1
    cost = pl.CostEstimate(
        flops=int(n_convs * N * (2 * 9 * C * C * HW + 4 * C * HW)),
        transcendentals=int(N * C),
        bytes_accessed=int(4 * N * C * HW * (1 + len(out_shapes))
                           + n_convs * (2 * 9 * C * C + 3 * 4 * C)))

    res = pl.pallas_call(
        _make_main_kernel(N, C, H, W, compute_dead_branch),
        out_shape=tuple(out_shapes),
        grid_spec=pltpu.PrefetchScalarGridSpec(
            num_scalar_prefetch=0,
            grid=(N,),
            in_specs=in_specs,
            out_specs=tuple(out_specs)),
        compiler_params=pltpu.CompilerParams(
            dimension_semantics=("parallel",),           # samples independent; v7x 2-TC split
            vmem_limit_bytes=_VMEM_LIMIT),
        cost_estimate=cost,
    )(*in_arrays)

    out = res[0].reshape(N, C, H, W)
    if compute_dead_branch:
        return out, res[1].reshape(N, C, H, W)
    return out


def _reference(x_nchw, params):
    """Pure-JAX reference with matching numerics (bf16 conv operands, f32 acc)."""
    w1, b1, g1, beta1, w2, b2, g2, beta2 = params
    x = x_nchw.astype(jnp.float32)

    def bn_relu(a, g, b):
        mean = jnp.mean(a, axis=(0, 2, 3), keepdims=True)
        var = jnp.mean((a - mean) ** 2, axis=(0, 2, 3), keepdims=True)
        xhat = (a - mean) * jax.lax.rsqrt(var + EPS)
        return jnp.maximum(xhat * g.reshape(1, -1, 1, 1) + b.reshape(1, -1, 1, 1), 0.0)

    def conv3x3(a, w, b):
        out = jax.lax.conv_general_dilated(
            a.astype(jnp.bfloat16), w.astype(jnp.bfloat16),
            window_strides=(1, 1), padding=((1, 1), (1, 1)),
            dimension_numbers=("NCHW", "OIHW", "NCHW"),
            preferred_element_type=jnp.float32)
        return out + b.reshape(1, -1, 1, 1)

    branch1 = conv3x3(bn_relu(x, g1, beta1), w1, b1)        # dead branch
    out = conv3x3(bn_relu(x, g2, beta2), w2, b2) + x        # identity shortcut
    return out, branch1


if __name__ == "__main__":
    # in_channels == out_channels == 4, stride == 1 (identity shortcut branch)
    N, C, H, W = 2, 4, 16, 16
    keys = jax.random.split(jax.random.PRNGKey(0), 9)
    x = jax.random.normal(keys[0], (N, C, H, W), jnp.float32)

    w1 = 0.1 * jax.random.normal(keys[1], (C, C, 3, 3), jnp.float32)
    b1 = 0.1 * jax.random.normal(keys[2], (C,), jnp.float32)
    w2 = 0.1 * jax.random.normal(keys[3], (C, C, 3, 3), jnp.float32)
    b2 = 0.1 * jax.random.normal(keys[4], (C,), jnp.float32)
    g1 = 1.0 + 0.1 * jax.random.normal(keys[5], (C,), jnp.float32)
    beta1 = 0.1 * jax.random.normal(keys[6], (C,), jnp.float32)
    g2 = 1.0 + 0.1 * jax.random.normal(keys[7], (C,), jnp.float32)
    beta2 = 0.1 * jax.random.normal(keys[8], (C,), jnp.float32)
    params = (w1, b1, g1, beta1, w2, b2, g2, beta2)

    ref_out, ref_branch = _reference(x, params)

    # Default path: dead conv1(relu(bn1(x))) branch is skipped entirely.
    out = jax.block_until_ready(preact_resblock(x, params))
    assert out.shape == (N, C, H, W)
    assert jnp.allclose(out, ref_out, atol=5e-3, rtol=5e-3), \
        float(jnp.max(jnp.abs(out - ref_out)))

    # Opt-in path: also compute the dead branch for faithfulness.
    out2, branch = preact_resblock(x, params, compute_dead_branch=True)
    out2 = jax.block_until_ready(out2)
    branch = jax.block_until_ready(branch)
    assert jnp.allclose(out2, ref_out, atol=5e-3, rtol=5e-3), \
        float(jnp.max(jnp.abs(out2 - ref_out)))
    assert jnp.allclose(branch, ref_branch, atol=5e-3, rtol=5e-3), \
        float(jnp.max(jnp.abs(branch - ref_branch)))

    print("KERNEL_OK")
</pallas_src>

<mosaic_0001>
module attributes {stable_mosaic.version = 11 : i64} {
  func.func @_stats_kernel(%arg0: i32, %arg1: memref<1x4x256xf32, #tpu.memory_space<vmem>>, %arg2: memref<4x1xf32, #tpu.memory_space<vmem>>, %arg3: memref<4x1xf32, #tpu.memory_space<vmem>>) attributes {dimension_semantics = [#tpu.dimension_semantics<arbitrary>], iteration_bounds = array<i64: 2>, scalar_prefetch = 0 : i64, scratch_operands = 0 : i64, tpu.core_type = #tpu.core_type<tc>, window_params = [{transform_indices = @transform_0, window_bounds = array<i64: 1, 4, 256>}, {pipeline_mode = #tpu.pipeline_mode<synchronous>, transform_indices = @transform_1, window_bounds = array<i64: 4, 1>}, {pipeline_mode = #tpu.pipeline_mode<synchronous>, transform_indices = @transform_2, window_bounds = array<i64: 4, 1>}]} {
    %c0_i32 = arith.constant 0 : i32
    %0 = arith.cmpi eq, %arg0, %c0_i32 : i32
    %1 = arith.extui %0 : i1 to i32
    %c0_i32_0 = arith.constant 0 : i32
    %2 = arith.cmpi ne, %1, %c0_i32_0 : i32
    scf.if %2 {
      %cst_12 = arith.constant 0.000000e+00 : f32
      %16 = vector.broadcast %cst_12 : f32 to vector<4x1xf32>
      %c0_13 = arith.constant 0 : index
      %c0_14 = arith.constant 0 : index
      %17 = vector.load %arg2[%c0_13, %c0_14] : memref<4x1xf32, #tpu.memory_space<vmem>>, vector<4x1xf32>
      tpu.vector_store %arg2[%c0_13, %c0_14], %16 {strides = array<i32>} : memref<4x1xf32, #tpu.memory_space<vmem>>, vector<4x1xf32>,
      %cst_15 = arith.constant 0.000000e+00 : f32
      %18 = vector.broadcast %cst_15 : f32 to vector<4x1xf32>
      %c0_16 = arith.constant 0 : index
      %c0_17 = arith.constant 0 : index
      %19 = vector.load %arg3[%c0_16, %c0_17] : memref<4x1xf32, #tpu.memory_space<vmem>>, vector<4x1xf32>
      tpu.vector_store %arg3[%c0_16, %c0_17], %18 {strides = array<i32>} : memref<4x1xf32, #tpu.memory_space<vmem>>, vector<4x1xf32>,
    } else {
    }
    %c0 = arith.constant 0 : index
    %c0_1 = arith.constant 0 : index
    %c0_2 = arith.constant 0 : index
    %3 = vector.load %arg1[%c0, %c0_1, %c0_2] : memref<1x4x256xf32, #tpu.memory_space<vmem>>, vector<1x4x256xf32>
    %4 = vector.shape_cast %3 : vector<1x4x256xf32> to vector<4x256xf32>
    %c0_3 = arith.constant 0 : index
    %c0_4 = arith.constant 0 : index
    %5 = vector.load %arg2[%c0_3, %c0_4] : memref<4x1xf32, #tpu.memory_space<vmem>>, vector<4x1xf32>
    %cst = arith.constant dense<0.000000e+00> : vector<4xf32>
    %6 = vector.multi_reduction <add>, %4, %cst [1] : vector<4x256xf32> to vector<4xf32>
    %7 = vector.shape_cast %6 : vector<4xf32> to vector<4x1xf32>
    %8 = arith.addf %5, %7 : vector<4x1xf32>
    %c0_5 = arith.constant 0 : index
    %c0_6 = arith.constant 0 : index
    %9 = vector.load %arg2[%c0_5, %c0_6] : memref<4x1xf32, #tpu.memory_space<vmem>>, vector<4x1xf32>
    tpu.vector_store %arg2[%c0_5, %c0_6], %8 {strides = array<i32>} : memref<4x1xf32, #tpu.memory_space<vmem>>, vector<4x1xf32>,
    %c0_7 = arith.constant 0 : index
    %c0_8 = arith.constant 0 : index
    %10 = vector.load %arg3[%c0_7, %c0_8] : memref<4x1xf32, #tpu.memory_space<vmem>>, vector<4x1xf32>
    %11 = arith.mulf %4, %4 : vector<4x256xf32>
    %cst_9 = arith.constant dense<0.000000e+00> : vector<4xf32>
    %12 = vector.multi_reduction <add>, %11, %cst_9 [1] : vector<4x256xf32> to vector<4xf32>
    %13 = vector.shape_cast %12 : vector<4xf32> to vector<4x1xf32>
    %14 = arith.addf %10, %13 : vector<4x1xf32>
    %c0_10 = arith.constant 0 : index
    %c0_11 = arith.constant 0 : index
    %15 = vector.load %arg3[%c0_10, %c0_11] : memref<4x1xf32, #tpu.memory_space<vmem>>, vector<4x1xf32>
    tpu.vector_store %arg3[%c0_10, %c0_11], %14 {strides = array<i32>} : memref<4x1xf32, #tpu.memory_space<vmem>>, vector<4x1xf32>,
    return
  }
  func.func @transform_0(%arg0: i32) -> (i32, i32, i32) {
    %c0_i32 = arith.constant 0 : i32
    %c0_i32_0 = arith.constant 0 : i32
    %c0_i32_1 = arith.constant 0 : i32
    return %arg0, %c0_i32, %c0_i32_0 : i32, i32, i32
  }
  func.func @transform_1(%arg0: i32) -> (i32, i32) {
    %c0_i32 = arith.constant 0 : i32
    %c0_i32_0 = arith.constant 0 : i32
    %c0_i32_1 = arith.constant 0 : i32
    return %c0_i32, %c0_i32_0 : i32, i32
  }
  func.func @transform_2(%arg0: i32) -> (i32, i32) {
    %c0_i32 = arith.constant 0 : i32
    %c0_i32_0 = arith.constant 0 : i32
    %c0_i32_1 = arith.constant 0 : i32
    return %c0_i32, %c0_i32_0 : i32, i32
  }
}

</mosaic_0001>

<bundles_post_ra>
// kernel: tpu_custom_call.1
= control target key start
LH: loop header
LB: loop body
LE: loop exit
PB: predicated region body
PF: predicated region fallthrough
CT: control target
= control target key end

     0   :  { %8 = vsyncpa [#allocation3], 0  ;;  %s480_s0 = inlined_call_operand.hbm [shape: f32[2,4,256], index: 0, kind: input, shape index: {}]   ;;  %s481_s1 = inlined_call_operand.vmem [shape: f32[4,1], index: 1, kind: output, shape index: {0}]   ;;  %s482_s2 = inlined_call_operand.vmem [shape: f32[4,1], index: 2, kind: output, shape index: {1}]  }
   0x1   :  { %10 = vsyncpa [#allocation3 + $0x1], 0  ;;  %s359_s9 = smov 0   ;;  %s361_s10 = smov 0  }
   0x2   :  { %s363_s11 = smov 0   ;;  %s365_s12 = smov 0  }
   0x3 LB: > { %s223_s13 = sadd.s32 4294967295, %s340_s12   ;;  %s379_s14 = sadd.s32 1, %s340_s12   ;;  %s340_s12 = sphi %s365_s12, %s490_s12   ;;  %s336_s11 = sphi %s363_s11, %s489_s11   ;;  %s332_s10 = sphi %s361_s10, %s488_s10   ;;  %s328_s9 = sphi %s359_s9, %s487_s9  }
   0x4   : > { %s20_s15 = ssub.s32 %s340_s12, %s379_s14  ;;  %s23_s16 = sadd.s32 1, %s336_s11 }
   0x5   : > { %p21_p0 = scmp.eq.s32.totalorder %s20_s15, 0  ;;  %p30_p1 = scmp.ne.s32.totalorder %s336_s11, %s332_s10 }
   0x6   : > { %p31_p2 = scmp.eq.s32.totalorder %s340_s12, 0  ;;  %p36_p3 = scmp.ne.s32.totalorder %s332_s10, %s328_s9 }
   0x7   : > { %s389_s17 = scalar_select %p21_p0, %s336_s11, %s23_s16  }
   0x8   : > { %p32_p4 = por %p31_p2, %p30_p1  ;;  %p37_p5 = scmp.eq.s32.totalorder %s223_s13, 0 }
   0x9   : > { %p241_p6 = scmp.lt.s32.totalorder %s340_s12, 2  ;;  %s102_s19 = sand.u32 1, %s336_s11  }
   0xa   : > { %p394_p7 = por %p37_p5, %p36_p3  ;;  %s226_s20 = sshll.u32 %s102_s19, 3 }
   0xb   : > { %s234_s21 = sshll.u32 %s340_s12, 7  ;;  %s106_s25 = scalar_lea.vmem [#allocation2], %s226_s20 }
   0xc   : > { %s403_s24 = scalar_lea.hbm %s480_s0, %s234_s21  ;;  %s114_s26 = sshll.u32 %s106_s25, 4  ;;  %s405_s26 = int_to_ptr.vmem [resolvable:$true] %s114_s26 }
   0xd   : > { %p407_p8 = pnand %p241_p6, %p32_p4  ;;  %s103_s28 = scalar_lea.sflag [#allocation3], %s102_s19 }
   0xe   : > { %s276_s29 = scalar_lea.hbm %s403_s24, 128  ;;  %s281_s4 = scalar_lea.hbm %s480_s0, 256 }
   0xf   : > { %p277_p11 = scmp.ne.s32.totalorder %s403_s24, %s276_s29  ;;  %p278_p12 = pneg %p407_p8 }
  0x10   : > { %p282_p1 = scmp.lt.u32.totalorder %s403_s24, %s480_s0  ;;  %p283_p2 = scmp.lt.u32.totalorder %s281_s4, %s276_s29 }
  0x11   : > { %p279_p13 = pnand %p278_p12, %p277_p11  ;;  %p285_p4 = scmp.lt.u32.totalorder %s276_s29, %s403_s24 }
  0x12   : > { %p284_p3 = por %p283_p2, %p282_p1 }
  0x13   : > { %p280_p0 = pneg %p279_p13 }
  0x14   : > { %p286_p5 = por %p285_p4, %p284_p3 }
  0x16   : > { %p287_p6 = pnand %p286_p5, %p280_p0 }
  0x18   : > { %290 = shalt.err (!%p287_p6)
}
  0x19   : > { %s291_s7 = scalar_lea.vmem %s405_s26, 128  ;;  %s342_s8 = smov [#allocation2]  }
  0x1a   : > { %p292_p11 = scmp.ne.s32.totalorder %s405_s26, %s291_s7  ;;  %s296_s9 = sshll.u32 %s342_s8, 4  ;;  %s297_s9 = int_to_ptr.vmem [resolvable:$false] %s296_s9 }
  0x1b   : > { %s298_s15 = scalar_lea.vmem %s297_s9, 256  ;;  %p299_p10 = scmp.lt.s32.totalorder %s405_s26, %s297_s9 }
  0x1c   : > { %p294_p13 = pnand %p292_p11, %p278_p12  ;;  %p300_p1 = scmp.lt.s32.totalorder %s298_s15, %s291_s7 }
  0x1e   : > { %p295_p9 = pneg %p294_p13  ;;  %p301_p2 = por %p300_p1, %p299_p10 }
  0x20   : > { %p302_p3 = pnand %p301_p2, %p295_p9 }
  0x22   : > { %305 = shalt.err (!%p302_p3)
}
  0x23   : > { %240 = dma.hbm_to_vmem [thread:$0]  (!%p407_p8), %s403_s24, 128, %s405_s26, %s103_s28  }
  0x24   : > { %p485_p0 = scmp.lt.s32.totalorder %s340_s12, 3  ;;  %p486_p4 = scmp.ge.s32.totalorder %s340_s12, 1 }
  0x26   : > { %p120_p12 = pnand %p486_p4, %p485_p0 }
  0x27   : > { %s125_s16 = sand.u32 (!%p120_p12), 1, %s332_s10  }
  0x28   : > { %123 = sbr.rel (%p120_p12) target bundleno = 212 (0xd4), region = 24  ;;  %s230_s19 = sshll.u32 (!%p120_p12), %s125_s16, 3 }
  0x29   : > { %s126_s20 = scalar_lea.sflag (!%p120_p12), [#allocation3], %s125_s16  ;;  %s129_s21 = scalar_lea.vmem (!%p120_p12), [#allocation2], %s230_s19 }
  0x2f   : > { %323 = dma.done.wait (%p394_p7), %s126_s20, 128  }
  0x30   : > { %325 = vsyncadd (%p394_p7), %s126_s20, 4294967168  ;;  %p231_p9 = scmp.ne.s32.totalorder %s223_s13, 0 }
  0x31   : > { %vm149_vm0 = vcmask (!%p231_p9), 3072   ;;  %v343_v0 = vmov (!%p231_p9), 0.0  }
  0x32   : > { %148 = sbr.rel (%p231_p9) target bundleno = 57 (0x39), region = 32  ;;  %150 = vst.msk [vmem:[%s481_s1] sm:$0xf] (!%p231_p9), %vm149_vm0, %v343_v0  ;;  %151 = vst.msk [vmem:[%s482_s2] sm:$0xf] (!%p231_p9), %vm149_vm0, %v343_v0 }
  0x39 PF: > { %v152_v1 = vld [vmem:[%s129_s21] sm:$0xff]  ;;  %vm157_vm1 = vcmask 1043456   ;;  %vm164_vm2 = vcmask 3072  }
  0x3a   : > { %v155_v2 = vcombine.high %v152_v1, %v152_v1  ;;  %v158_v3 = vsel %vm157_vm1, %v152_v1, 0.0  ;;  %v167_v4 = vmul.f32 %v152_v1, %v152_v1  ;;  %v153_v11 = vld [vmem:[%s481_s1] sm:$0xf] }
  0x3b   : > { %v166_v14 = vld [vmem:[%s482_s2] sm:$0xf] }
  0x3c   : > { %v159_v5 = vsel %vm157_vm1, %v155_v2, 0.0  ;;  %v169_v6 = vcombine.high %v167_v4, %v167_v4  ;;  %v171_v7 = vsel %vm157_vm1, %v167_v4, 0.0 }
  0x3d   : > { %v160_v8 = vadd.f32 %v159_v5, %v158_v3 }
  0x3e   : > { %v172_v9 = vsel %vm157_vm1, %v169_v6, 0.0 }
  0x3f   : > { %161 = vadd.xlane.f32.xlu0 %v160_v8  ;;  %v173_v10 = vadd.f32 %v172_v9, %v171_v7 }
  0x43   : > { %174 = vadd.xlane.f32.xlu0 %v173_v10 }
  0xcc   : > { %v162_v12 = vpop.xlane.xlu0 %161 }
  0xcd   : > { %v163_v13 = vadd.f32 %v162_v12, %v153_v11 }
  0xcf   : > { %165 = vst.msk [vmem:[%s481_s1] sm:$0xf] %vm164_vm2, %v163_v13 }
  0xd0   : > { %v175_v15 = vpop.xlane.xlu0 %174 }
  0xd1   : > { %v176_v16 = vadd.f32 %v175_v15, %v166_v14 }
  0xd3   : > { %177 = vst.msk [vmem:[%s482_s2] sm:$0xf] %vm164_vm2, %v176_v16 }
  0xd4 PF: > { %p13_p7 = scmp.ge.s32.totalorder %s379_s14, 4   ;;  %s487_s9 = smov %s332_s10 }
  0xd5   : > { %s488_s10 = smov %s336_s11  ;;  %s489_s11 = smov %s389_s17 }
  0xd6   : > { %s490_s12 = smov %s379_s14  ;;  %15 = sbr.rel (!%p13_p7) target bundleno = 3 (0x3), region = 72 }
  0xdd   :  { %195 = vsyncpa [#allocation3], 1 }
  0xde   :  { %197 = vsyncpa [#allocation3 + $0x1], 1 }

</bundles_post_ra>
